<compile_context>
chip_gen: v7x
topology: tpu7x:2x2x1
jax: 0.10.0
libtpu: 0.0.40
codegen_flags: <defaults>
</compile_context>

<pallas_src>
import numpy as np
import jax
import jax.numpy as jnp
from jax import lax
from jax.experimental import pallas as pl
from jax.experimental.pallas import tpu as pltpu

EPS = 1e-5
LANE = 128   # vreg lane width
SUB = 8      # vreg sublane width


def _round_up(x, m):
    return (x + m - 1) // m * m


# ----------------------------------------------------------------------------
# Pallas kernels
# ----------------------------------------------------------------------------
def _mm_stats_kernel(p_ref, w_ref, y_ref, stats_ref):
    """y = p @ w (bf16 operands, f32 accumulate) + per-tile BN partial stats."""
    y = jnp.dot(p_ref[...], w_ref[...], preferred_element_type=jnp.float32)
    y_ref[...] = y
    # Per-channel partial sum / sum-of-squares for this tile (rows 0 and 1 of
    # an 8-row, lane-dense stats block; remaining rows are zero padding).
    stats_ref[...] = jnp.zeros_like(stats_ref)
    stats_ref[0:1, :] = jnp.sum(y, axis=0, keepdims=True)
    stats_ref[1:2, :] = jnp.sum(y * y, axis=0, keepdims=True)


def _bn_relu_kernel(y_ref, scale_ref, bias_ref, o_ref):
    """o = relu(y * scale + bias)  -- BN folded into per-channel affine."""
    o = jnp.maximum(y_ref[...] * scale_ref[...] + bias_ref[...], 0.0)
    o_ref[...] = o.astype(o_ref.dtype)


def _bn_res_relu_kernel(y_ref, scale_ref, bias_ref, xd_ref, wd_ref, o_ref):
    """o = relu(y * scale + bias + xd @ wd)  -- BN + fused 1x1 downsample skip."""
    res = jnp.dot(xd_ref[...], wd_ref[...], preferred_element_type=jnp.float32)
    o = jnp.maximum(y_ref[...] * scale_ref[...] + bias_ref[...] + res, 0.0)
    o_ref[...] = o.astype(o_ref.dtype)


# ----------------------------------------------------------------------------
# Pallas wrappers (tiled over the M row axis)
# ----------------------------------------------------------------------------
_PARALLEL = pltpu.CompilerParams(dimension_semantics=("parallel",))


def _matmul_with_stats(p, w, tile_m):
    """p: (Mp, K) bf16, w: (K, Cp) bf16 -> (y (Mp, Cp) f32, stats (nt*8, Cp) f32)."""
    Mp, K = p.shape
    Cp = w.shape[1]
    nt = Mp // tile_m
    return pl.pallas_call(
        _mm_stats_kernel,
        out_shape=(jax.ShapeDtypeStruct((Mp, Cp), jnp.float32),
                   jax.ShapeDtypeStruct((nt * SUB, Cp), jnp.float32)),
        grid=(nt,),
        in_specs=[pl.BlockSpec((tile_m, K), lambda i: (i, 0)),
                  pl.BlockSpec((K, Cp), lambda i: (0, 0))],       # resident weights
        out_specs=(pl.BlockSpec((tile_m, Cp), lambda i: (i, 0)),
                   pl.BlockSpec((SUB, Cp), lambda i: (i, 0))),
        compiler_params=_PARALLEL,
    )(p, w)


def _bn_relu(y, scale, bias, tile_m, out_dtype):
    Mp, Cp = y.shape
    nt = Mp // tile_m
    return pl.pallas_call(
        _bn_relu_kernel,
        out_shape=jax.ShapeDtypeStruct((Mp, Cp), out_dtype),
        grid=(nt,),
        in_specs=[pl.BlockSpec((tile_m, Cp), lambda i: (i, 0)),
                  pl.BlockSpec((1, Cp), lambda i: (0, 0)),
                  pl.BlockSpec((1, Cp), lambda i: (0, 0))],
        out_specs=pl.BlockSpec((tile_m, Cp), lambda i: (i, 0)),
        compiler_params=_PARALLEL,
    )(y, scale, bias)


def _bn_res_relu(y, scale, bias, xd, wd, tile_m, out_dtype):
    Mp, Cp = y.shape
    Kd = xd.shape[1]
    nt = Mp // tile_m
    return pl.pallas_call(
        _bn_res_relu_kernel,
        out_shape=jax.ShapeDtypeStruct((Mp, Cp), out_dtype),
        grid=(nt,),
        in_specs=[pl.BlockSpec((tile_m, Cp), lambda i: (i, 0)),
                  pl.BlockSpec((1, Cp), lambda i: (0, 0)),
                  pl.BlockSpec((1, Cp), lambda i: (0, 0)),
                  pl.BlockSpec((tile_m, Kd), lambda i: (i, 0)),
                  pl.BlockSpec((Kd, Cp), lambda i: (0, 0))],      # resident 1x1 weights
        out_specs=pl.BlockSpec((tile_m, Cp), lambda i: (i, 0)),
        compiler_params=_PARALLEL,
    )(y, scale, bias, xd, wd)


# ----------------------------------------------------------------------------
# Plain-JAX glue: im2col patches, weight reordering, BN stat reduction
# ----------------------------------------------------------------------------
def extract_patches_nhwc(x, ksize, stride, pad):
    """(N,H,W,C) -> (N,Ho,Wo,ksize*ksize*C), last-axis order (kh, kw, c)."""
    N, H, W, C = x.shape
    xp = jnp.pad(x, ((0, 0), (pad, pad), (pad, pad), (0, 0)))
    Ho = (H + 2 * pad - ksize) // stride + 1
    Wo = (W + 2 * pad - ksize) // stride + 1
    cols = []
    for di in range(ksize):
        for dj in range(ksize):
            cols.append(xp[:, di:di + stride * Ho:stride, dj:dj + stride * Wo:stride, :])
    return jnp.concatenate(cols, axis=-1), Ho, Wo


def reorder_oihw_to_mat(w_oihw, cout_pad):
    """(Cout,Cin,kh,kw) -> (kh*kw*Cin, cout_pad) bf16, matching (kh,kw,c) patch order."""
    Cout, Cin, kh, kw = w_oihw.shape
    w = jnp.transpose(w_oihw, (2, 3, 1, 0)).reshape(kh * kw * Cin, Cout)
    return jnp.pad(w, ((0, 0), (0, cout_pad - Cout))).astype(jnp.bfloat16)


def _bn_scale_bias(stats, gamma_p, beta_p, m_real):
    """Reduce per-tile partials -> per-channel affine (scale, bias) in f32."""
    st = stats.reshape(-1, SUB, stats.shape[-1])
    s = jnp.sum(st[:, 0, :], axis=0)
    ss = jnp.sum(st[:, 1, :], axis=0)
    mean = s / m_real
    # TODO(synk): shifted/Welford accumulation if M grows large enough for
    # E[x^2]-E[x]^2 cancellation to matter.
    var = jnp.maximum(ss / m_real - mean * mean, 0.0)
    rstd = lax.rsqrt(var + EPS)
    scale = gamma_p * rstd
    bias = beta_p - mean * scale
    return (scale.reshape(1, -1).astype(jnp.float32),
            bias.reshape(1, -1).astype(jnp.float32))


# ----------------------------------------------------------------------------
# Full ResBlockDownSamp forward
# ----------------------------------------------------------------------------
def res_block_down_samp(x_nchw, params, tile_m=512):
    w1, g1, b1, w2, g2, b2, wd = params
    N, Cin, H, W = x_nchw.shape
    Cout = w1.shape[0]
    Cp = _round_up(Cout, LANE)                       # lane-dense channel dim

    x = jnp.transpose(x_nchw, (0, 2, 3, 1)).astype(jnp.float32)   # NHWC

    # ---- conv1 (3x3, stride 2, pad 1) as im2col matmul ---------------------
    p1, Ho, Wo = extract_patches_nhwc(x, 3, 2, 1)                 # (N,Ho,Wo,9*Cin)
    M = N * Ho * Wo
    tile_m = _round_up(min(tile_m, _round_up(M, SUB)), SUB)
    Mp = _round_up(M, tile_m)

    p1 = jnp.pad(p1.reshape(M, -1).astype(jnp.bfloat16), ((0, Mp - M), (0, 0)))
    w1m = reorder_oihw_to_mat(w1, Cp)                             # (9*Cin, Cp) bf16

    y1_raw, st1 = _matmul_with_stats(p1, w1m, tile_m)             # (Mp, Cp) f32
    g1p = jnp.pad(g1, (0, Cp - Cout)).astype(jnp.float32)
    b1p = jnp.pad(b1, (0, Cp - Cout)).astype(jnp.float32)
    sc1, bi1 = _bn_scale_bias(st1, g1p, b1p, M)
    y1 = _bn_relu(y1_raw, sc1, bi1, tile_m, jnp.bfloat16)         # (Mp, Cp) bf16

    # ---- conv2 (3x3, stride 1, 'same') + bn2 + 1x1 skip + relu -------------
    y1_img = y1[:M, :Cout].reshape(N, Ho, Wo, Cout)               # drop padding
    p2, _, _ = extract_patches_nhwc(y1_img, 3, 1, 1)              # (N,Ho,Wo,9*Cout) bf16
    p2 = jnp.pad(p2.reshape(M, -1), ((0, Mp - M), (0, 0)))
    w2m = reorder_oihw_to_mat(w2, Cp)                             # (9*Cout, Cp) bf16

    y2_raw, st2 = _matmul_with_stats(p2, w2m, tile_m)             # (Mp, Cp) f32
    g2p = jnp.pad(g2, (0, Cp - Cout)).astype(jnp.float32)
    b2p = jnp.pad(b2, (0, Cp - Cout)).astype(jnp.float32)
    sc2, bi2 = _bn_scale_bias(st2, g2p, b2p, M)

    # 1x1 stride-2 downsample of the input, fused into the final kernel.
    xd = x[:, ::2, ::2, :].reshape(M, Cin).astype(jnp.bfloat16)
    xd = jnp.pad(xd, ((0, Mp - M), (0, 0)))
    wdm = jnp.pad(wd.reshape(Cout, Cin).T,
                  ((0, 0), (0, Cp - Cout))).astype(jnp.bfloat16)  # (Cin, Cp)

    out = _bn_res_relu(y2_raw, sc2, bi2, xd, wdm, tile_m, jnp.float32)
    out = out[:M, :Cout].reshape(N, Ho, Wo, Cout)
    return jnp.transpose(out, (0, 3, 1, 2))                       # back to NCHW


# ----------------------------------------------------------------------------
# References for the correctness check
# ----------------------------------------------------------------------------
def _bn_train(y, g, b):
    mu = jnp.mean(y, axis=(0, 2, 3), keepdims=True)
    var = jnp.mean((y - mu) ** 2, axis=(0, 2, 3), keepdims=True)
    return (y - mu) * lax.rsqrt(var + EPS) * g.reshape(1, -1, 1, 1) + b.reshape(1, -1, 1, 1)


def reference(x, params, bf16_matmul):
    """PyTorch-semantics forward. With bf16_matmul=True the conv operands are
    cast to bf16 at the same points as the Pallas kernels (tight check)."""
    w1, g1, b1, w2, g2, b2, wd = params
    dn = ("NCHW", "OIHW", "NCHW")
    cast = (lambda a: a.astype(jnp.bfloat16)) if bf16_matmul else (lambda a: a)
    conv = lambda a, w, s, p: lax.conv_general_dilated(
        cast(a), cast(w), s, p, dimension_numbers=dn,
        preferred_element_type=jnp.float32)
    y1 = conv(x, w1, (2, 2), ((1, 1), (1, 1)))
    y1 = jnp.maximum(_bn_train(y1, g1, b1), 0.0)
    if bf16_matmul:
        y1 = y1.astype(jnp.bfloat16).astype(jnp.float32)   # kernel stores y1 as bf16
    y2 = conv(y1, w2, (1, 1), ((1, 1), (1, 1)))
    y2 = _bn_train(y2, g2, b2)
    res = conv(x, wd, (2, 2), ((0, 0), (0, 0)))
    return jnp.maximum(y2 + res, 0.0)


# ----------------------------------------------------------------------------
if __name__ == "__main__":
    N, Cin, H, W = 2, 4, 16, 16
    Cout = Cin * 2  # out_channels == -1 -> in_channels * 2

    key = jax.random.PRNGKey(0)
    k = jax.random.split(key, 8)
    x = jax.random.normal(k[0], (N, Cin, H, W), dtype=jnp.float32)
    w1 = 0.1 * jax.random.normal(k[1], (Cout, Cin, 3, 3), dtype=jnp.float32)
    w2 = 0.1 * jax.random.normal(k[2], (Cout, Cout, 3, 3), dtype=jnp.float32)
    wd = 0.1 * jax.random.normal(k[3], (Cout, Cin, 1, 1), dtype=jnp.float32)
    g1 = 1.0 + 0.1 * jax.random.normal(k[4], (Cout,), dtype=jnp.float32)
    b1 = 0.1 * jax.random.normal(k[5], (Cout,), dtype=jnp.float32)
    g2 = 1.0 + 0.1 * jax.random.normal(k[6], (Cout,), dtype=jnp.float32)
    b2 = 0.1 * jax.random.normal(k[7], (Cout,), dtype=jnp.float32)
    params = (w1, g1, b1, w2, g2, b2, wd)

    # tile_m=64 -> 2 row-tiles at this toy size, exercising the tiled two-pass BN.
    out = jax.block_until_ready(res_block_down_samp(x, params, tile_m=64))
    assert out.shape == (N, Cout, H // 2, W // 2), out.shape

    # Tight check vs a reference using the same deliberate bf16 MXU casts
    # (validates layout, BN stats, residual fusion, ReLU).
    ref_bf16 = jax.block_until_ready(reference(x, params, bf16_matmul=True))
    np.testing.assert_allclose(np.asarray(out), np.asarray(ref_bf16),
                               rtol=5e-3, atol=5e-3)

    # Loose sanity check vs the pure-f32 PyTorch-semantics reference
    # (tolerance reflects the intentional bf16 MXU operands).
    ref_f32 = jax.block_until_ready(reference(x, params, bf16_matmul=False))
    np.testing.assert_allclose(np.asarray(out), np.asarray(ref_f32),
                               rtol=5e-2, atol=5e-2)

    print("KERNEL_OK")
</pallas_src>

<mosaic_0001>
module attributes {stable_mosaic.version = 11 : i64} {
  func.func @_mm_stats_kernel(%arg0: i32, %arg1: memref<64x36xbf16, #tpu.memory_space<vmem>>, %arg2: memref<36x128xbf16, #tpu.memory_space<vmem>>, %arg3: memref<64x128xf32, #tpu.memory_space<vmem>>, %arg4: memref<8x128xf32, #tpu.memory_space<vmem>>) attributes {dimension_semantics = [#tpu.dimension_semantics<parallel>], iteration_bounds = array<i64: 2>, scalar_prefetch = 0 : i64, scratch_operands = 0 : i64, tpu.core_type = #tpu.core_type<tc>, window_params = [{transform_indices = @transform_0, window_bounds = array<i64: 64, 36>}, {pipeline_mode = #tpu.pipeline_mode<synchronous>, transform_indices = @transform_1, window_bounds = array<i64: 36, 128>}, {transform_indices = @transform_2, window_bounds = array<i64: 64, 128>}, {transform_indices = @transform_3, window_bounds = array<i64: 8, 128>}]} {
    %c0 = arith.constant 0 : index
    %c0_0 = arith.constant 0 : index
    %0 = vector.load %arg1[%c0, %c0_0] : memref<64x36xbf16, #tpu.memory_space<vmem>>, vector<64x36xbf16>
    %c0_1 = arith.constant 0 : index
    %c0_2 = arith.constant 0 : index
    %1 = vector.load %arg2[%c0_1, %c0_2] : memref<36x128xbf16, #tpu.memory_space<vmem>>, vector<36x128xbf16>
    %cst = arith.constant dense<0.000000e+00> : vector<64x128xf32>
    %2 = tpu.matmul %0, %1, %cst {dimension_numbers = #tpu.dot_dimension_numbers<[1], [0], [0], [1], [0, 0, 1, 1], [], []>} : vector<64x36xbf16>, vector<36x128xbf16>, vector<64x128xf32> -> vector<64x128xf32>
    %c0_3 = arith.constant 0 : index
    %c0_4 = arith.constant 0 : index
    %3 = vector.load %arg3[%c0_3, %c0_4] : memref<64x128xf32, #tpu.memory_space<vmem>>, vector<64x128xf32>
    tpu.vector_store %arg3[%c0_3, %c0_4], %2 {strides = array<i32>} : memref<64x128xf32, #tpu.memory_space<vmem>>, vector<64x128xf32>,
    %cst_5 = arith.constant 0.000000e+00 : f32
    %4 = vector.broadcast %cst_5 : f32 to vector<8x128xf32>
    %c0_6 = arith.constant 0 : index
    %c0_7 = arith.constant 0 : index
    %5 = vector.load %arg4[%c0_6, %c0_7] : memref<8x128xf32, #tpu.memory_space<vmem>>, vector<8x128xf32>
    tpu.vector_store %arg4[%c0_6, %c0_7], %4 {strides = array<i32>} : memref<8x128xf32, #tpu.memory_space<vmem>>, vector<8x128xf32>,
    %cst_8 = arith.constant dense<0.000000e+00> : vector<128xf32>
    %6 = vector.multi_reduction <add>, %2, %cst_8 [0] : vector<64x128xf32> to vector<128xf32>
    %7 = vector.shape_cast %6 : vector<128xf32> to vector<1x128xf32>
    %c0_9 = arith.constant 0 : index
    %c0_10 = arith.constant 0 : index
    %8 = vector.load %arg4[%c0_9, %c0_10] : memref<8x128xf32, #tpu.memory_space<vmem>>, vector<1x128xf32>
    tpu.vector_store %arg4[%c0_9, %c0_10], %7 {strides = array<i32>} : memref<8x128xf32, #tpu.memory_space<vmem>>, vector<1x128xf32>,
    %9 = arith.mulf %2, %2 : vector<64x128xf32>
    %cst_11 = arith.constant dense<0.000000e+00> : vector<128xf32>
    %10 = vector.multi_reduction <add>, %9, %cst_11 [0] : vector<64x128xf32> to vector<128xf32>
    %11 = vector.shape_cast %10 : vector<128xf32> to vector<1x128xf32>
    %c1 = arith.constant 1 : index
    %c0_12 = arith.constant 0 : index
    %12 = vector.load %arg4[%c1, %c0_12] : memref<8x128xf32, #tpu.memory_space<vmem>>, vector<1x128xf32>
    tpu.vector_store %arg4[%c1, %c0_12], %11 {strides = array<i32>} : memref<8x128xf32, #tpu.memory_space<vmem>>, vector<1x128xf32>,
    return
  }
  func.func @transform_0(%arg0: i32) -> (i32, i32) {
    %c0_i32 = arith.constant 0 : i32
    %c0_i32_0 = arith.constant 0 : i32
    return %arg0, %c0_i32 : i32, i32
  }
  func.func @transform_1(%arg0: i32) -> (i32, i32) {
    %c0_i32 = arith.constant 0 : i32
    %c0_i32_0 = arith.constant 0 : i32
    %c0_i32_1 = arith.constant 0 : i32
    return %c0_i32, %c0_i32_0 : i32, i32
  }
  func.func @transform_2(%arg0: i32) -> (i32, i32) {
    %c0_i32 = arith.constant 0 : i32
    %c0_i32_0 = arith.constant 0 : i32
    return %arg0, %c0_i32 : i32, i32
  }
  func.func @transform_3(%arg0: i32) -> (i32, i32) {
    %c0_i32 = arith.constant 0 : i32
    %c0_i32_0 = arith.constant 0 : i32
    return %arg0, %c0_i32 : i32, i32
  }
}

</mosaic_0001>

<bundles_post_ra>
// kernel: tpu_custom_call.1
= control target key start
LH: loop header
LB: loop body
LE: loop exit
PB: predicated region body
PF: predicated region fallthrough
CT: control target
= control target key end

     0   :  { %9 = vsyncpa [#allocation3], 0  ;;  %s867_s0 = inlined_call_operand.vmem [shape: bf16[128,36], index: 0, kind: input, shape index: {}]   ;;  %s868_s1 = inlined_call_operand.vmem [shape: bf16[36,128], index: 1, kind: input, shape index: {}]   ;;  %s869_s2 = inlined_call_operand.hbm [shape: f32[128,128], index: 2, kind: output, shape index: {0}]   ;;  %s870_s3 = inlined_call_operand.hbm [shape: f32[16,128], index: 3, kind: output, shape index: {1}]  }
   0x1   :  { %11 = vsyncpa [#allocation3 + $0x1], 0 }
   0x2   :  { %12 = vsyncpa [#allocation5], 0 }
   0x3   :  { %14 = vsyncpa [#allocation5 + $0x1], 0  ;;  %s716_s12 = smov 0   ;;  %s718_s13 = smov 0  }
   0x4   :  { %s720_s14 = smov 0   ;;  %s722_s15 = smov 0  }
   0x5 LB: > { %s737_s16 = sadd.s32 4294967295, %s689_s15   ;;  %s485_s17 = sadd.s32 4294967294, %s689_s15   ;;  %s689_s15 = sphi %s722_s15, %s876_s15   ;;  %s685_s14 = sphi %s720_s14, %s875_s14   ;;  %s681_s13 = sphi %s718_s13, %s874_s13   ;;  %s677_s12 = sphi %s716_s12, %s873_s12  }
   0x6   : > { %s741_s18 = sadd.s32 1, %s689_s15   ;;  %s74_s19 = sadd.s32 1, %s685_s14 }
   0x7   : > { %s71_s20 = ssub.s32 %s689_s15, %s741_s18  ;;  %p84_p0 = scmp.ne.s32.totalorder %s685_s14, %s681_s13 }
   0x8   : > { %p72_p1 = scmp.eq.s32.totalorder %s71_s20, 0  ;;  %p85_p2 = scmp.eq.s32.totalorder %s737_s16, 1 }
   0x9   : > { %p90_p3 = scmp.ne.s32.totalorder %s681_s13, %s677_s12  ;;  %p91_p4 = scmp.eq.s32.totalorder %s485_s17, 1 }
   0xa   : > { %s752_s21 = scalar_select %p72_p1, %s685_s14, %s74_s19  }
   0xb   : > { %p754_p5 = por %p85_p2, %p84_p0  ;;  %p758_p6 = por %p91_p4, %p90_p3 }
   0xc   : > { %p488_p7 = scmp.ge.s32.totalorder %s689_s15, 1  ;;  %p147_p8 = scmp.lt.s32.totalorder %s689_s15, 3 }
   0xe   : > { %p148_p9 = pnand %p488_p7, %p147_p8 }
   0xf   : > { %v588_v0 = vld [vmem:[%s868_s1] sm:$0xff] (!%p148_p9)   ;;  %v589_v1 = vld [vmem:[%s868_s1 + $0x8] sm:$0xff] (!%p148_p9)   ;;  %s491_s28 = sshll.u32 (!%p148_p9), %s737_s16, 3  ;;  %v590_v2 = vld [vmem:[%s868_s1 + $0x10] ss:$0 sps:$4 sm:$0x33] (!%p148_p9)  }
  0x10   : > { %151 = sbr.rel (%p148_p9) target bundleno = 296 (0x128), region = 28  ;;  %519 = vmatprep.subr.bf16.mxu0 (!%p148_p9), %v588_v0  ;;  %533 = vmatprep.subr.bf16.mxu1 (!%p148_p9), %v588_v0  ;;  %p177_p10 = scmp.lt.s32.totalorder (!%p148_p9), %s491_s28, 15  ;;  %vm245_vm0 = vcmask (!%p148_p9), 1041408   ;;  %vm232_vm1 = vcmask (!%p148_p9), 293888   ;;  %v691_v8 = vmov (!%p148_p9), 0.0  }
  0x11   : > { %520 = vmatpush3.bf16.msra.mxu0 (!%p148_p9), %v588_v0  ;;  %536 = vmatpush3.bf16.msra.mxu1 (!%p148_p9), %v588_v0  ;;  %v247_v3 = vsel (!%p148_p9), %vm245_vm0, %v590_v2, 0  ;;  %s778_s8 = sand.u32 (!%p148_p9), 1, %s681_s13   ;;  %s511_s17 = sshll.u32 (!%p148_p9), %s737_s16, 10 }
  0x12   : > { %521 = vmatprep.subr.bf16.mxu0 (!%p148_p9), %v589_v1  ;;  %534 = vmatprep.subr.bf16.mxu1 (!%p148_p9), %v589_v1  ;;  %s490_s9 = sshll.u32 (!%p148_p9), %s778_s8, 3  ;;  %s489_s11 = sshll.u32 (!%p148_p9), %s778_s8, 6 }
  0x13   : > { %s781_s10 = scalar_lea.vmem (!%p148_p9), [#allocation4], %s490_s9  ;;  %s168_s19 = scalar_lea.vmem (!%p148_p9), [#allocation2], %s489_s11 }
  0x14   : > { %322 = vst [vmem:[%s781_s10] sm:$0xff] (!%p148_p9), %v691_v8  ;;  %s378_s20 = sshll.u32 (!%p148_p9), %s168_s19, 4  ;;  %s789_s26 = scalar_lea.hbm (!%p148_p9), %s869_s2, %s511_s17  ;;  %s791_s20 = int_to_ptr.vmem [resolvable:$true] %s378_s20 }
  0x15   : > { %522 = vmatpush3.bf16.msra.mxu0 (!%p148_p9), %v589_v1  ;;  %537 = vmatpush3.bf16.msra.mxu1 (!%p148_p9), %v589_v1  ;;  %s360_s27 = scalar_lea.sflag (!%p148_p9), [#allocation3], %s778_s8  ;;  %s692_s29 = smov (!%p148_p9), [#allocation2]  }
  0x16   : > { %539 = vmatprep.subr.msk.bf16.mxu0 (!%p148_p9), %vm245_vm0, %v590_v2  ;;  %540 = vmatprep.subr.msk.bf16.mxu1 (!%p148_p9), %vm245_vm0, %v590_v2  ;;  %s599_s30 = sshll.u32 (!%p148_p9), %s692_s29, 4  ;;  %s600_s30 = int_to_ptr.vmem [resolvable:$false] %s599_s30 }
  0x17   : > { %s878_s28 = smov (!%p177_p10, %s491_s28), 15  ;;  %p602_p0 = scmp.lt.s32.totalorder %s791_s20, %s600_s30 }
  0x18   : > { %s492_s4 = sshll.u32 %s878_s28, 2  ;;  %s595_s28 = scalar_lea.vmem %s791_s20, 1024 }
  0x19   : > { %s180_s7 = scalar_lea.vmem %s867_s0, %s492_s4  ;;  %524 = vmatpush3.bf16.msra.mxu0 %v247_v3  ;;  %538 = vmatpush3.bf16.msra.mxu1 %v247_v3  ;;  %p596_p11 = scmp.ne.s32.totalorder %s791_s20, %s595_s28 }
  0x1a   : > { %v591_v4 = vld [vmem:[%s180_s7] sm:$0xff]   ;;  %v592_v5 = vld [vmem:[%s180_s7 + $0x8] sm:$0xff]   ;;  %v593_v6 = vld [vmem:[%s180_s7 + $0x10] sm:$0xff]   ;;  %s601_s4 = scalar_lea.vmem %s600_s30, 2048 }
  0x1b   : > { %525 = vmatprep.mubr.msk.bf16.mxu0 %vm232_vm1, %v591_v4  ;;  %v594_v7 = vld [vmem:[%s180_s7 + $0x18] sm:$0xff]   ;;  %529 = vmatprep.mubr.msk.bf16.mxu1 %vm232_vm1, %v593_v6  ;;  %p597_p12 = pnand %p596_p11, %p754_p5  ;;  %p603_p1 = scmp.lt.s32.totalorder %s601_s4, %s595_s28 }
  0x1c   : > { %526 = vmatmul.mubr.msk.bf16.vlgmr.msra.gmra.mrb[0].mxu0 %vm232_vm1, %v592_v5  ;;  %530 = vmatmul.mubr.msk.bf16.vlgmr.msra.gmra.mrb[0].mxu1 %vm232_vm1, %v594_v7 }
  0x1d   : > { %p598_p13 = pneg %p597_p12  ;;  %p604_p2 = por %p603_p1, %p602_p0 }
  0x1f   : > { %p605_p3 = pnand %p604_p2, %p598_p13 }
  0xef   : > { %v527_v9 = vpop.f32.mrb[0].mxu0  ;;  %v531_v10 = vpop.f32.mrb[0].mxu1 }
  0xf0   : > { %316 = vst [vmem:[%s168_s19 + $0x10] sm:$0xff] %v527_v9  ;;  %v283_v11 = vpop.f32.mrb[1].mxu0  ;;  %320 = vst [vmem:[%s168_s19 + $0x30] sm:$0xff] %v531_v10  ;;  %v299_v12 = vpop.f32.mrb[1].mxu1 }
  0xf1   : > { %314 = vst [vmem:[%s168_s19] sm:$0xff] %v283_v11  ;;  %v528_v13 = vpop.f32.mrb[2].mxu0  ;;  %318 = vst [vmem:[%s168_s19 + $0x20] sm:$0xff] %v299_v12  ;;  %v532_v14 = vpop.f32.mrb[2].mxu1  ;;  %v337_v17 = vmul.f32 %v283_v11, %v283_v11 }
  0xf2   : > { %317 = vst [vmem:[%s168_s19 + $0x18] sm:$0xff] %v528_v13  ;;  %v286_v15 = vpop.f32.mrb[3].mxu0  ;;  %321 = vst [vmem:[%s168_s19 + $0x38] sm:$0xff] %v532_v14  ;;  %v302_v16 = vpop.f32.mrb[3].mxu1 }
  0xf3   : > { %315 = vst [vmem:[%s168_s19 + $0x8] sm:$0xff] %v286_v15  ;;  %v323_v18 = vadd.f32 %v286_v15, %v283_v11  ;;  %v338_v19 = vmul.f32 %v286_v15, %v286_v15  ;;  %319 = vst [vmem:[%s168_s19 + $0x28] sm:$0xff] %v302_v16 }
  0xf4   : > { %608 = shalt.err (!%p605_p3)
}
  0xf5   : > { %s609_s5 = scalar_lea.hbm %s789_s26, 1024  ;;  %s613_s9 = scalar_lea.hbm %s869_s2, 2048 }
  0xf6   : > { %p610_p4 = scmp.ne.s32.totalorder %s789_s26, %s609_s5  ;;  %p614_p9 = scmp.lt.u32.totalorder %s789_s26, %s869_s2 }
  0xf7   : > { %p615_p10 = scmp.lt.u32.totalorder %s613_s9, %s609_s5  ;;  %p617_p12 = scmp.lt.u32.totalorder %s609_s5, %s789_s26 }
  0xf8   : > { %p611_p7 = pnand %p610_p4, %p754_p5 }
  0xf9   : > { %p616_p11 = por %p615_p10, %p614_p9 }
  0xfa   : > { %p612_p8 = pneg %p611_p7 }
  0xfb   : > { %p618_p13 = por %p617_p12, %p616_p11 }
  0xfd   : > { %p619_p0 = pnand %p618_p13, %p612_p8 }
  0xff   : > { %622 = shalt.err (!%p619_p0)
}
 0x100   : > { %s693_s19 = smov 128   ;;  %s694_s24 = smov 8   ;;  %v339_v20 = vmul.f32 %v527_v9, %v527_v9  ;;  %v324_v21 = vadd.f32 %v527_v9, %v323_v18  ;;  %v345_v22 = vadd.f32 %v338_v19, %v337_v17  ;;  %v340_v23 = vmul.f32 %v528_v13, %v528_v13 }
 0x101   : > { %541 = dma.vmem_to_hbm [thread:$0]  (%p754_p5), %s791_s20, 1024, %s789_s26, %s360_s27, %s693_s19, %s693_s19, %s694_s24   ;;  %v341_v26 = vmul.f32 %v299_v12, %v299_v12  ;;  %v342_v31 = vmul.f32 %v302_v16, %v302_v16  ;;  %v343_v32 = vmul.f32 %v531_v10, %v531_v10  ;;  %v344_v35 = vmul.f32 %v532_v14, %v532_v14 }
 0x102   : > { %v346_v24 = vadd.f32 %v345_v22, %v339_v20  ;;  %v325_v25 = vadd.f32 %v528_v13, %v324_v21  ;;  %s508_s20 = sshll.u32 %s737_s16, 7  ;;  %s394_s25 = sshll.u32 %s781_s10, 4  ;;  %s825_s25 = int_to_ptr.vmem [resolvable:$true] %s394_s25 }
 0x103   : > { %s823_s28 = scalar_lea.hbm %s870_s3, %s508_s20  ;;  %s365_s29 = scalar_lea.sflag [#allocation5], %s778_s8 }
 0x104   : > { %v326_v27 = vadd.f32 %v325_v25, %v299_v12  ;;  %v347_v28 = vadd.f32 %v346_v24, %v340_v23  ;;  %s623_s30 = scalar_lea.vmem %s825_s25, 128  ;;  %s695_s16 = smov [#allocation4]  }
 0x105   : > { %p624_p1 = scmp.ne.s32.totalorder %s825_s25, %s623_s30  ;;  %s627_s4 = sshll.u32 %s695_s16, 4  ;;  %s628_s4 = int_to_ptr.vmem [resolvable:$false] %s627_s4 }
 0x106   : > { %v348_v29 = vadd.f32 %v347_v28, %v341_v26  ;;  %v327_v30 = vadd.f32 %v326_v27, %v302_v16  ;;  %s629_s5 = scalar_lea.vmem %s628_s4, 256  ;;  %p630_p4 = scmp.lt.s32.totalorder %s825_s25, %s628_s4 }
 0x107   : > { %p625_p2 = pnand %p624_p1, %p754_p5  ;;  %p631_p7 = scmp.lt.s32.totalorder %s629_s5, %s623_s30 }
 0x108   : > { %v328_v33 = vadd.f32 %v531_v10, %v327_v30  ;;  %v349_v34 = vadd.f32 %v348_v29, %v342_v31 }
 0x109   : > { %p626_p3 = pneg %p625_p2  ;;  %p632_p8 = por %p631_p7, %p630_p4 }
 0x10a   : > { %v329_v36 = vadd.f32 %v532_v14, %v328_v33  ;;  %v350_v37 = vadd.f32 %v349_v34, %v343_v32 }
 0x10b   : > { %p633_p9 = pnand %p632_p8, %p626_p3 }
 0x10c   : > { %v330_v38 = vrot.slane %v329_v36, 4  ;;  %v351_v39 = vadd.f32 %v350_v37, %v344_v35 }
 0x10e   : > { %v331_v40 = vadd.f32 %v330_v38, %v329_v36  ;;  %v352_v41 = vrot.slane %v351_v39, 4 }
 0x110   : > { %v332_v42 = vrot.slane %v331_v40, 2  ;;  %v353_v43 = vadd.f32 %v352_v41, %v351_v39 }
 0x112   : > { %v333_v44 = vadd.f32 %v332_v42, %v331_v40  ;;  %v354_v45 = vrot.slane %v353_v43, 2 }
 0x114   : > { %v334_v46 = vrot.slane %v333_v44, 1  ;;  %v355_v47 = vadd.f32 %v354_v45, %v353_v43 }
 0x116   : > { %v335_v48 = vadd.f32 %v334_v46, %v333_v44  ;;  %v356_v49 = vrot.slane %v355_v47, 1 }
 0x118   : > { %336 = vst [vmem:[%s781_s10] sm:$0x1] %v335_v48  ;;  %v357_v50 = vadd.f32 %v356_v49, %v355_v47 }
 0x11a   : > { %358 = vst [vmem:[%s781_s10 + $0x1] sm:$0x1] %v357_v50 }
 0x11b   : > { %636 = shalt.err (!%p633_p9)
}
 0x11c   : > { %s637_s8 = scalar_lea.hbm %s823_s28, 128  ;;  %s641_s7 = scalar_lea.hbm %s870_s3, 256 }
 0x11d   : > { %p638_p10 = scmp.ne.s32.totalorder %s823_s28, %s637_s8  ;;  %p642_p13 = scmp.lt.u32.totalorder %s823_s28, %s870_s3 }
 0x11e   : > { %p643_p0 = scmp.lt.u32.totalorder %s641_s7, %s637_s8  ;;  %p645_p2 = scmp.lt.u32.totalorder %s637_s8, %s823_s28 }
 0x11f   : > { %p639_p11 = pnand %p638_p10, %p754_p5 }
 0x120   : > { %p644_p1 = por %p643_p0, %p642_p13 }
 0x121   : > { %p640_p12 = pneg %p639_p11 }
 0x122   : > { %p646_p3 = por %p645_p2, %p644_p1 }
 0x124   : > { %p647_p4 = pnand %p646_p3, %p640_p12 }
 0x126   : > { %650 = shalt.err (!%p647_p4)
}
 0x127   : > { %542 = dma.vmem_to_hbm [thread:$0]  (%p754_p5), %s825_s25, 128, %s823_s28, %s365_s29  }
 0x128 PF: > { %p552_p7 = scmp.ge.s32.totalorder %s689_s15, 2  ;;  %s406_s17 = sand.u32 1, %s677_s12  }
 0x129   : > { %s407_s19 = scalar_lea.sflag [#allocation3], %s406_s17 }
 0x12a   : > { %p546_p8 = pnand %p552_p7, %p758_p6 }
 0x12c   : > { %668 = dma.done.wait (!%p546_p8), %s407_s19, 1024  }
 0x12d   : > { %670 = vsyncadd (!%p546_p8), %s407_s19, 4294966272  ;;  %s416_s24 = scalar_lea.sflag [#allocation5], %s406_s17 }
 0x12e   : > { %672 = dma.done.wait (!%p546_p8), %s416_s24, 128  }
 0x12f   : > { %674 = vsyncadd (!%p546_p8), %s416_s24, 4294967168  ;;  %p17_p5 = scmp.ge.s32.totalorder %s741_s18, 4   ;;  %s873_s12 = smov %s681_s13 }
 0x130   : > { %s874_s13 = smov %s685_s14  ;;  %s875_s14 = smov %s752_s21 }
 0x131   : > { %s876_s15 = smov %s741_s18  ;;  %19 = sbr.rel (!%p17_p5) target bundleno = 5 (0x5), region = 80 }
 0x138   :  { %421 = vsyncpa [#allocation3], 1 }
 0x139   :  { %423 = vsyncpa [#allocation3 + $0x1], 1 }
 0x13a   :  { %424 = vsyncpa [#allocation5], 1 }
 0x13b   :  { %426 = vsyncpa [#allocation5 + $0x1], 1 }

</bundles_post_ra>
